<compile_context>
chip_gen: v5e
topology: v5e:2x2
jax: 0.10.0
libtpu: 0.0.40
codegen_flags: <defaults>
</compile_context>

<pallas_src>
import jax
import jax.numpy as jnp
from jax.experimental import pallas as pl
from jax.experimental.pallas import tpu as pltpu


def _round_up(n, m):
    return ((n + m - 1) // m) * m


def mlp_kernel(x_ref, w1_ref, b1_ref, w2_ref, b2_ref, w3_ref, b3_ref,
               w4_ref, b4_ref, o_ref, acc_ref):
    """One (batch-block b, vocab-block k) grid step.

    Layer-1 [B_tile, V] @ [V, 256] is tiled over K and accumulated into an
    f32 VMEM scratch; the small layers 2-4 + sigmoid run on the last K step.
    """
    k = pl.program_id(1)

    @pl.when(k == 0)
    def _():
        acc_ref[...] = jnp.zeros_like(acc_ref)

    # Layer-1 partial product on the MXU, f32 accumulation.
    acc_ref[...] += jnp.dot(x_ref[...], w1_ref[...],
                            preferred_element_type=jnp.float32)

    @pl.when(k == pl.num_programs(1) - 1)
    def _():
        # Layer 1 epilogue: bias + ReLU.   (Dropout(0.2) -> identity in eval.)
        h = jnp.maximum(acc_ref[...] + b1_ref[...], 0.0)
        # Layer 2: [B_tile, 256] @ [256, 128] + b ; ReLU.  (Dropout -> identity.)
        h = jnp.maximum(
            jnp.dot(h, w2_ref[...], preferred_element_type=jnp.float32)
            + b2_ref[...], 0.0)
        # Layer 3: [B_tile, 128] @ [128, 64] + b ; ReLU.
        h = jnp.maximum(
            jnp.dot(h, w3_ref[...], preferred_element_type=jnp.float32)
            + b3_ref[...], 0.0)
        # Layer 4 (64 -> 1): VPU multiply + lane reduction (no padded MXU pass,
        # no dead output lanes).
        logits = jnp.sum(h * w4_ref[...], axis=-1, keepdims=True) + b4_ref[...]
        o_ref[...] = jax.nn.sigmoid(logits)


def movie_review_nn_forward(x, params, *, b_tile=128, tk=2048,
                            bf16_layer1=False):
    """x: [B, vocab_size] float32.  Returns [B, 1] float32 (sigmoid probs).

    b_tile : batch rows per grid block (rounded to a multiple of 8).
    tk     : vocab (K) tile for layer 1 (rounded to a multiple of 128).
             2048 keeps double-buffered x/w1 blocks well under v7x's scoped
             VMEM; v5e/v6e (128 MiB VMEM) can go larger if desired.
    bf16_layer1: store x/w1 in bfloat16 (f32 accumulation) to halve the
             dominant HBM stream.
    """
    w1, b1, w2, b2, w3, b3, w4, b4 = params
    B, V = x.shape

    # Batch tile: multiple of 8 sublanes, at most b_tile.
    bt = _round_up(min(b_tile, _round_up(B, 8)), 8)
    B_pad = _round_up(B, bt)

    # K tile: multiple of 128 lanes, no larger than the (padded) vocab.
    tk = _round_up(min(tk, _round_up(V, 128)), 128)
    V_pad = _round_up(V, tk)

    # Optional bf16 for the big layer-1 operands only (w2..w4 stay resident
    # f32; their traffic is negligible).
    if bf16_layer1:
        xp = x.astype(jnp.bfloat16)
        w1p = w1.astype(jnp.bfloat16)
    else:
        xp, w1p = x, w1

    # Zero-pad batch/vocab to tile multiples (zeros don't change the dot).
    if B_pad != B or V_pad != V:
        xp = jnp.pad(xp, ((0, B_pad - B), (0, V_pad - V)))
    if V_pad != V:
        w1p = jnp.pad(w1p, ((0, V_pad - V), (0, 0)))

    w4row = w4.reshape(1, 64)  # (64, 1) -> (1, 64) for the VPU reduction

    grid = (B_pad // bt, V_pad // tk)

    out = pl.pallas_call(
        mlp_kernel,
        out_shape=jax.ShapeDtypeStruct((B_pad, 1), jnp.float32),
        grid=grid,
        in_specs=[
            pl.BlockSpec((bt, tk), lambda b, k: (b, k)),     # x   (tiled B, K)
            pl.BlockSpec((tk, 256), lambda b, k: (k, 0)),    # w1  (streamed K)
            pl.BlockSpec((1, 256), lambda b, k: (0, 0)),     # b1  (resident)
            pl.BlockSpec((256, 128), lambda b, k: (0, 0)),   # w2  (resident)
            pl.BlockSpec((1, 128), lambda b, k: (0, 0)),     # b2  (resident)
            pl.BlockSpec((128, 64), lambda b, k: (0, 0)),    # w3  (resident)
            pl.BlockSpec((1, 64), lambda b, k: (0, 0)),      # b3  (resident)
            pl.BlockSpec((1, 64), lambda b, k: (0, 0)),      # w4  (resident row)
            pl.BlockSpec((1, 1), lambda b, k: (0, 0)),       # b4  (resident)
        ],
        out_specs=pl.BlockSpec((bt, 1), lambda b, k: (b, 0)),
        scratch_shapes=[pltpu.VMEM((bt, 256), jnp.float32)],  # layer-1 accumulator
        compiler_params=pltpu.CompilerParams(
            # batch axis -> megacore-parallel (v7x); K reduction -> arbitrary
            dimension_semantics=("parallel", "arbitrary")),
    )(xp, w1p, b1, w2, b2, w3, b3, w4row, b4)

    return out[:B]  # drop batch padding -> [B, 1]


def init_params(key, vocab_size):
    """Deterministic PyTorch-style uniform(-1/sqrt(fan_in), 1/sqrt(fan_in)) init."""
    dims = [(vocab_size, 256), (256, 128), (128, 64), (64, 1)]
    params = []
    for (fan_in, fan_out) in dims:
        key, kw, kb = jax.random.split(key, 3)
        bound = 1.0 / jnp.sqrt(jnp.float32(fan_in))
        w = jax.random.uniform(kw, (fan_in, fan_out), jnp.float32, -bound, bound)
        b = jax.random.uniform(kb, (1, fan_out), jnp.float32, -bound, bound)
        params += [w, b]
    return tuple(params)


def reference_forward(x, params):
    """Pure-JAX reference for correctness check."""
    w1, b1, w2, b2, w3, b3, w4, b4 = params
    h = jnp.maximum(x @ w1 + b1, 0.0)
    h = jnp.maximum(h @ w2 + b2, 0.0)
    h = jnp.maximum(h @ w3 + b3, 0.0)
    return jax.nn.sigmoid(h @ w4 + b4)


if __name__ == "__main__":
    key = jax.random.PRNGKey(0)
    kx, kp = jax.random.split(key)

    B, VOCAB = 8, 512  # small synthetic shapes
    x = jax.random.uniform(kx, (B, VOCAB), jnp.float32)  # bag-of-words style input
    params = init_params(kp, VOCAB)
    y_ref = reference_forward(x, params)

    # f32 run; tk=256 exercises the K-tiled accumulation (grid = (1, 2)).
    y = movie_review_nn_forward(x, params, b_tile=8, tk=256)
    y = jax.block_until_ready(y)
    assert y.shape == (B, 1), y.shape
    assert jnp.allclose(y, y_ref, atol=1e-5, rtol=1e-5), "f32 mismatch vs reference"

    # bf16 layer-1 path (halves the dominant w1/x HBM stream); looser tolerance.
    y16 = movie_review_nn_forward(x, params, b_tile=8, tk=256, bf16_layer1=True)
    y16 = jax.block_until_ready(y16)
    assert y16.shape == (B, 1), y16.shape
    assert jnp.allclose(y16, y_ref, atol=1e-2, rtol=1e-2), "bf16 mismatch vs reference"

    print("KERNEL_OK")
</pallas_src>

<mosaic_0001>
module attributes {stable_mosaic.version = 11 : i64} {
  func.func @mlp_kernel(%arg0: i32, %arg1: i32, %arg2: memref<8x256xf32, #tpu.memory_space<vmem>>, %arg3: memref<256x256xf32, #tpu.memory_space<vmem>>, %arg4: memref<1x256xf32, #tpu.memory_space<vmem>>, %arg5: memref<256x128xf32, #tpu.memory_space<vmem>>, %arg6: memref<1x128xf32, #tpu.memory_space<vmem>>, %arg7: memref<128x64xf32, #tpu.memory_space<vmem>>, %arg8: memref<1x64xf32, #tpu.memory_space<vmem>>, %arg9: memref<1x64xf32, #tpu.memory_space<vmem>>, %arg10: memref<1x1xf32, #tpu.memory_space<vmem>>, %arg11: memref<8x1xf32, #tpu.memory_space<vmem>>, %arg12: memref<8x256xf32, #tpu.memory_space<vmem>>) attributes {dimension_semantics = [#tpu.dimension_semantics<parallel>, #tpu.dimension_semantics<arbitrary>], iteration_bounds = array<i64: 1, 2>, scalar_prefetch = 0 : i64, scratch_operands = 1 : i64, tpu.core_type = #tpu.core_type<tc>, window_params = [{transform_indices = @transform_0, window_bounds = array<i64: 8, 256>}, {transform_indices = @transform_1, window_bounds = array<i64: 256, 256>}, {pipeline_mode = #tpu.pipeline_mode<synchronous>, transform_indices = @transform_2, window_bounds = array<i64: 1, 256>}, {pipeline_mode = #tpu.pipeline_mode<synchronous>, transform_indices = @transform_3, window_bounds = array<i64: 256, 128>}, {pipeline_mode = #tpu.pipeline_mode<synchronous>, transform_indices = @transform_4, window_bounds = array<i64: 1, 128>}, {pipeline_mode = #tpu.pipeline_mode<synchronous>, transform_indices = @transform_5, window_bounds = array<i64: 128, 64>}, {pipeline_mode = #tpu.pipeline_mode<synchronous>, transform_indices = @transform_6, window_bounds = array<i64: 1, 64>}, {pipeline_mode = #tpu.pipeline_mode<synchronous>, transform_indices = @transform_7, window_bounds = array<i64: 1, 64>}, {pipeline_mode = #tpu.pipeline_mode<synchronous>, transform_indices = @transform_8, window_bounds = array<i64: 1, 1>}, {transform_indices = @transform_9, window_bounds = array<i64: 8, 1>}]} {
    %c0_i32 = arith.constant 0 : i32
    %0 = arith.cmpi eq, %arg1, %c0_i32 : i32
    %1 = arith.extui %0 : i1 to i32
    %c0_i32_0 = arith.constant 0 : i32
    %2 = arith.cmpi ne, %1, %c0_i32_0 : i32
    scf.if %2 {
      %cst_9 = arith.constant 0.000000e+00 : f32
      %12 = vector.broadcast %cst_9 : f32 to vector<8x256xf32>
      %c0_10 = arith.constant 0 : index
      %c0_11 = arith.constant 0 : index
      %13 = vector.load %arg12[%c0_10, %c0_11] : memref<8x256xf32, #tpu.memory_space<vmem>>, vector<8x256xf32>
      tpu.vector_store %arg12[%c0_10, %c0_11], %12 {strides = array<i32>} : memref<8x256xf32, #tpu.memory_space<vmem>>, vector<8x256xf32>,
    } else {
    }
    %c0 = arith.constant 0 : index
    %c0_1 = arith.constant 0 : index
    %3 = vector.load %arg12[%c0, %c0_1] : memref<8x256xf32, #tpu.memory_space<vmem>>, vector<8x256xf32>
    %c0_2 = arith.constant 0 : index
    %c0_3 = arith.constant 0 : index
    %4 = vector.load %arg2[%c0_2, %c0_3] : memref<8x256xf32, #tpu.memory_space<vmem>>, vector<8x256xf32>
    %c0_4 = arith.constant 0 : index
    %c0_5 = arith.constant 0 : index
    %5 = vector.load %arg3[%c0_4, %c0_5] : memref<256x256xf32, #tpu.memory_space<vmem>>, vector<256x256xf32>
    %cst = arith.constant dense<0.000000e+00> : vector<8x256xf32>
    %6 = tpu.matmul %4, %5, %cst {dimension_numbers = #tpu.dot_dimension_numbers<[1], [0], [0], [1], [0, 0, 1, 1], [], []>} : vector<8x256xf32>, vector<256x256xf32>, vector<8x256xf32> -> vector<8x256xf32>
    %7 = arith.addf %3, %6 : vector<8x256xf32>
    %c0_6 = arith.constant 0 : index
    %c0_7 = arith.constant 0 : index
    %8 = vector.load %arg12[%c0_6, %c0_7] : memref<8x256xf32, #tpu.memory_space<vmem>>, vector<8x256xf32>
    tpu.vector_store %arg12[%c0_6, %c0_7], %7 {strides = array<i32>} : memref<8x256xf32, #tpu.memory_space<vmem>>, vector<8x256xf32>,
    %c1_i32 = arith.constant 1 : i32
    %9 = arith.cmpi eq, %arg1, %c1_i32 : i32
    %10 = arith.extui %9 : i1 to i32
    %c0_i32_8 = arith.constant 0 : i32
    %11 = arith.cmpi ne, %10, %c0_i32_8 : i32
    scf.if %11 {
      %c0_9 = arith.constant 0 : index
      %c0_10 = arith.constant 0 : index
      %12 = vector.load %arg12[%c0_9, %c0_10] : memref<8x256xf32, #tpu.memory_space<vmem>>, vector<8x256xf32>
      %c0_11 = arith.constant 0 : index
      %c0_12 = arith.constant 0 : index
      %13 = vector.load %arg4[%c0_11, %c0_12] : memref<1x256xf32, #tpu.memory_space<vmem>>, vector<1x256xf32>
      %14 = vector.broadcast %13 : vector<1x256xf32> to vector<8x256xf32>
      %15 = arith.addf %12, %14 : vector<8x256xf32>
      %cst_13 = arith.constant 0.000000e+00 : f32
      %16 = vector.broadcast %cst_13 : f32 to vector<8x256xf32>
      %17 = arith.maximumf %15, %16 : vector<8x256xf32>
      %c0_14 = arith.constant 0 : index
      %c0_15 = arith.constant 0 : index
      %18 = vector.load %arg5[%c0_14, %c0_15] : memref<256x128xf32, #tpu.memory_space<vmem>>, vector<256x128xf32>
      %cst_16 = arith.constant dense<0.000000e+00> : vector<8x128xf32>
      %19 = tpu.matmul %17, %18, %cst_16 {dimension_numbers = #tpu.dot_dimension_numbers<[1], [0], [0], [1], [0, 0, 1, 1], [], []>} : vector<8x256xf32>, vector<256x128xf32>, vector<8x128xf32> -> vector<8x128xf32>
      %c0_17 = arith.constant 0 : index
      %c0_18 = arith.constant 0 : index
      %20 = vector.load %arg6[%c0_17, %c0_18] : memref<1x128xf32, #tpu.memory_space<vmem>>, vector<1x128xf32>
      %21 = vector.broadcast %20 : vector<1x128xf32> to vector<8x128xf32>
      %22 = arith.addf %19, %21 : vector<8x128xf32>
      %cst_19 = arith.constant 0.000000e+00 : f32
      %23 = vector.broadcast %cst_19 : f32 to vector<8x128xf32>
      %24 = arith.maximumf %22, %23 : vector<8x128xf32>
      %c0_20 = arith.constant 0 : index
      %c0_21 = arith.constant 0 : index
      %25 = vector.load %arg7[%c0_20, %c0_21] : memref<128x64xf32, #tpu.memory_space<vmem>>, vector<128x64xf32>
      %cst_22 = arith.constant dense<0.000000e+00> : vector<8x64xf32>
      %26 = tpu.matmul %24, %25, %cst_22 {dimension_numbers = #tpu.dot_dimension_numbers<[1], [0], [0], [1], [0, 0, 1, 1], [], []>} : vector<8x128xf32>, vector<128x64xf32>, vector<8x64xf32> -> vector<8x64xf32>
      %c0_23 = arith.constant 0 : index
      %c0_24 = arith.constant 0 : index
      %27 = vector.load %arg8[%c0_23, %c0_24] : memref<1x64xf32, #tpu.memory_space<vmem>>, vector<1x64xf32>
      %28 = vector.broadcast %27 : vector<1x64xf32> to vector<8x64xf32>
      %29 = arith.addf %26, %28 : vector<8x64xf32>
      %cst_25 = arith.constant 0.000000e+00 : f32
      %30 = vector.broadcast %cst_25 : f32 to vector<8x64xf32>
      %31 = arith.maximumf %29, %30 : vector<8x64xf32>
      %c0_26 = arith.constant 0 : index
      %c0_27 = arith.constant 0 : index
      %32 = vector.load %arg9[%c0_26, %c0_27] : memref<1x64xf32, #tpu.memory_space<vmem>>, vector<1x64xf32>
      %33 = vector.broadcast %32 : vector<1x64xf32> to vector<8x64xf32>
      %34 = arith.mulf %31, %33 : vector<8x64xf32>
      %cst_28 = arith.constant dense<0.000000e+00> : vector<8xf32>
      %35 = vector.multi_reduction <add>, %34, %cst_28 [1] : vector<8x64xf32> to vector<8xf32>
      %36 = vector.shape_cast %35 : vector<8xf32> to vector<8x1xf32>
      %c0_29 = arith.constant 0 : index
      %c0_30 = arith.constant 0 : index
      %37 = vector.load %arg10[%c0_29, %c0_30] : memref<1x1xf32, #tpu.memory_space<vmem>>, vector<1x1xf32>
      %38 = vector.broadcast %37 : vector<1x1xf32> to vector<8x1xf32>
      %39 = arith.addf %36, %38 : vector<8x1xf32>
      %40 = arith.negf %39 : vector<8x1xf32>
      %41 = math.exp %40 : vector<8x1xf32>
      %cst_31 = arith.constant 1.000000e+00 : f32
      %42 = vector.broadcast %cst_31 : f32 to vector<8x1xf32>
      %43 = arith.addf %42, %41 : vector<8x1xf32>
      %44 = arith.divf %42, %43 : vector<8x1xf32>
      %c0_32 = arith.constant 0 : index
      %c0_33 = arith.constant 0 : index
      %45 = vector.load %arg11[%c0_32, %c0_33] : memref<8x1xf32, #tpu.memory_space<vmem>>, vector<8x1xf32>
      tpu.vector_store %arg11[%c0_32, %c0_33], %44 {strides = array<i32>} : memref<8x1xf32, #tpu.memory_space<vmem>>, vector<8x1xf32>,
    } else {
    }
    return
  }
  func.func @transform_0(%arg0: i32, %arg1: i32) -> (i32, i32) {
    %c0_i32 = arith.constant 0 : i32
    return %arg0, %arg1 : i32, i32
  }
  func.func @transform_1(%arg0: i32, %arg1: i32) -> (i32, i32) {
    %c0_i32 = arith.constant 0 : i32
    %c0_i32_0 = arith.constant 0 : i32
    return %arg1, %c0_i32 : i32, i32
  }
  func.func @transform_2(%arg0: i32, %arg1: i32) -> (i32, i32) {
    %c0_i32 = arith.constant 0 : i32
    %c0_i32_0 = arith.constant 0 : i32
    %c0_i32_1 = arith.constant 0 : i32
    return %c0_i32, %c0_i32_0 : i32, i32
  }
  func.func @transform_3(%arg0: i32, %arg1: i32) -> (i32, i32) {
    %c0_i32 = arith.constant 0 : i32
    %c0_i32_0 = arith.constant 0 : i32
    %c0_i32_1 = arith.constant 0 : i32
    return %c0_i32, %c0_i32_0 : i32, i32
  }
  func.func @transform_4(%arg0: i32, %arg1: i32) -> (i32, i32) {
    %c0_i32 = arith.constant 0 : i32
    %c0_i32_0 = arith.constant 0 : i32
    %c0_i32_1 = arith.constant 0 : i32
    return %c0_i32, %c0_i32_0 : i32, i32
  }
  func.func @transform_5(%arg0: i32, %arg1: i32) -> (i32, i32) {
    %c0_i32 = arith.constant 0 : i32
    %c0_i32_0 = arith.constant 0 : i32
    %c0_i32_1 = arith.constant 0 : i32
    return %c0_i32, %c0_i32_0 : i32, i32
  }
  func.func @transform_6(%arg0: i32, %arg1: i32) -> (i32, i32) {
    %c0_i32 = arith.constant 0 : i32
    %c0_i32_0 = arith.constant 0 : i32
    %c0_i32_1 = arith.constant 0 : i32
    return %c0_i32, %c0_i32_0 : i32, i32
  }
  func.func @transform_7(%arg0: i32, %arg1: i32) -> (i32, i32) {
    %c0_i32 = arith.constant 0 : i32
    %c0_i32_0 = arith.constant 0 : i32
    %c0_i32_1 = arith.constant 0 : i32
    return %c0_i32, %c0_i32_0 : i32, i32
  }
  func.func @transform_8(%arg0: i32, %arg1: i32) -> (i32, i32) {
    %c0_i32 = arith.constant 0 : i32
    %c0_i32_0 = arith.constant 0 : i32
    %c0_i32_1 = arith.constant 0 : i32
    return %c0_i32, %c0_i32_0 : i32, i32
  }
  func.func @transform_9(%arg0: i32, %arg1: i32) -> (i32, i32) {
    %c0_i32 = arith.constant 0 : i32
    %c0_i32_0 = arith.constant 0 : i32
    return %arg0, %c0_i32 : i32, i32
  }
}

</mosaic_0001>

<bundles_post_ra>
// kernel: tpu_custom_call.1
= control target key start
LH: loop header
LB: loop body
LE: loop exit
PB: predicated region body
PF: predicated region fallthrough
CT: control target
= control target key end

     0   :  { %s1369_s0 = inlined_call_operand.vmem [shape: f32[8,512], index: 0, kind: input, shape index: {}]   ;;  %s1370_s1 = inlined_call_operand.hbm [shape: f32[512,256], index: 1, kind: input, shape index: {}]   ;;  %s1371_s2 = inlined_call_operand.vmem [shape: f32[1,256], index: 2, kind: input, shape index: {}]   ;;  %s1372_s3 = inlined_call_operand.hbm [shape: f32[256,128], index: 3, kind: input, shape index: {}]   ;;  %s1373_s4 = inlined_call_operand.vmem [shape: f32[1,128], index: 4, kind: input, shape index: {}]   ;;  %s1374_s5 = inlined_call_operand.vmem [shape: f32[128,64], index: 5, kind: input, shape index: {}]   ;;  %s1375_s6 = inlined_call_operand.vmem [shape: f32[1,64], index: 6, kind: input, shape index: {}]   ;;  %s1376_s7 = inlined_call_operand.vmem [shape: f32[1,64], index: 7, kind: input, shape index: {}]   ;;  %s1377_s8 = inlined_call_operand.<no memory space> [shape: f32[1,1], index: 8, kind: input, shape index: {}]   ;;  %s1378_s9 = inlined_call_operand.vmem [shape: f32[8,1], index: 9, kind: output, shape index: {}]  }
   0x1   :  { %1380 = sst [smem:[#allocation11_spill]] %s1372_s3  ;;  %v14_v0 = vstv %s1377_s8 }
   0x2   :  { %1381 = sst [smem:[#allocation12_spill]] %s1378_s9  ;;  %15 = vst [vmem:[#allocation3] sm:$0x1] %v14_v0 }
   0x3   :  { %16 = vsyncpa [#allocation5], 0 }
   0x4   :  { %18 = vsyncpa [#allocation5 + $0x1], 0 }
   0x5   :  { %19 = vsyncpa [#allocation7], 0  ;;  %s1122_s11 = smov 0   ;;  %s1124_s12 = smov 0  }
   0x6   :  { %s1126_s13 = smov 0   ;;  %s1128_s14 = smov 0  }
   0x7   :  { %s1130_s15 = smov 0   ;;  %s1132_s16 = smov 0  }
   0x8 LB: > { %s847_s8 = sadd.s32 4294967295, %s1061_s16   ;;  %p85_p0 = scmp.ne.s32.totalorder %s1045_s12, %s1041_s11  ;;  %s1061_s16 = sphi %s1132_s16, %s25_s16   ;;  %s1057_s15 = sphi %s1130_s15, %s1394_s15   ;;  %s1053_s14 = sphi %s1128_s14, %s1393_s14   ;;  %s1049_s13 = sphi %s1126_s13, %s1392_s13   ;;  %s1045_s12 = sphi %s1124_s12, %s1391_s12   ;;  %s1041_s11 = sphi %s1122_s11, %s1390_s11  }
   0x9   : > { %p1152_p1 = scmp.eq.s32.totalorder %s847_s8, 0  ;;  %p848_p2 = scmp.ge.s32.totalorder %s1061_s16, 1 }
   0xa   : > { %p269_p3 = scmp.lt.s32.totalorder %s1061_s16, 3  ;;  %s1384_s3 = sld [smem:[#allocation11_spill]] }
   0xb   : > { %p1160_p4 = por %p1152_p1, %p85_p0  ;;  %s1063_s23 = smov [#allocation6]  }
   0xc   : > { %p1167_p5 = pnand %p848_p2, %p269_p3  ;;  %s285_s24 = sshll.u32 %s1063_s23, 4  ;;  %s286_s24 = int_to_ptr.vmem [resolvable:$true] %s285_s24 }
   0xd   : > { %s1064_s25 = smov 128   ;;  %s1065_s26 = smov 8  }
   0xe   : > { %p874_p6 = pneg %p1167_p5  ;;  %s34_s27 = sadd.s32 1, %s1057_s15 }
   0xf   : > { %p35_p8 = scmp.ge.s32.totalorder %s34_s27, 2  ;;  %s72_s28 = sadd.s32 1, %s1049_s13 }
  0x10   : > { %s283_s21 = sshll.u32 %s1384_s3, 4  ;;  %p875_p7 = pnand %p874_p6, %p1152_p1  ;;  %s284_s21 = int_to_ptr.hbm [resolvable:$true] %s283_s21 }
  0x11   : > { %p79_p9 = scmp.ne.s32.totalorder %s1049_s13, %s1045_s12  ;;  %p80_p10 = scmp.eq.s32.totalorder %s1061_s16, 0 }
  0x12   : > { %877 = dma.hbm_to_vmem [thread:$0]  (!%p875_p7), %s284_s21, 4096, %s286_s24, [#allocation7], %s1064_s25, %s1064_s25, %s1065_s26  }
  0x13   : > { %s1396_s27 = smov (%p35_p8, %s34_s27), 0  ;;  %p1182_p11 = por %p80_p10, %p79_p9 }
  0x14   : > { %1386 = sst [smem:[#allocation10_spill]] %s1396_s27  ;;  %p883_p12 = scmp.lt.s32.totalorder %s1061_s16, 2 }
  0x15   : > { %s69_s30 = ssub.s32 %s1057_s15, %s1396_s27  ;;  %s327_s10 = sand.u32 1, %s1049_s13  }
  0x16   : > { %p70_p13 = scmp.eq.s32.totalorder %s69_s30, 0  ;;  %s851_s11 = sshll.u32 %s327_s10, 9 }
  0x17   : > { %s867_s8 = sshll.u32 %s1057_s15, 9  ;;  %s331_s25 = scalar_lea.vmem [#allocation4], %s851_s11 }
  0x18   : > { %s1192_s19 = scalar_select %p70_p13, %s1049_s13, %s72_s28  }
  0x19   : > { %s337_s23 = scalar_lea.hbm %s1370_s1, %s867_s8  ;;  %s340_s26 = sshll.u32 %s331_s25, 4  ;;  %s341_s26 = int_to_ptr.vmem [resolvable:$true] %s340_s26 }
  0x1a   : > { %s338_s24 = sshll.u32 %s337_s23, 4  ;;  %p879_p0 = pnand %p883_p12, %p1182_p11  ;;  %s339_s24 = int_to_ptr.hbm [resolvable:$true] %s338_s24 }
  0x1b   : > { %s328_s3 = scalar_lea.sflag [#allocation5], %s327_s10  ;;  %s1066_s27 = smov 256  }
  0x1c   : > { %s1067_s9 = smov 16   ;;  %352 = sbr.rel (%p1167_p5) target bundleno = 666 (0x29a), region = 56 }
  0x1d   : > { %881 = dma.hbm_to_vmem [thread:$0]  (!%p879_p0), %s339_s24, 8192, %s341_s26, %s328_s3, %s1066_s27, %s1066_s27, %s1067_s9  }
  0x1e   : > { %s354_s28 = sand.u32 (!%p1167_p5), 1, %s1045_s12  }
  0x1f   : > { %s856_s30 = sshll.u32 (!%p1167_p5), %s354_s28, 9  ;;  %s355_s8 = scalar_lea.sflag (!%p1167_p5), [#allocation5], %s354_s28 }
  0x20   : > { %s1204_s20 = scalar_lea.vmem (!%p1167_p5), [#allocation4], %s856_s30 }
  0x21   : > { %1032 = dma.done.wait (%p1160_p4), %s355_s8, 8192  }
  0x22   : > { %1034 = vsyncadd (%p1160_p4), %s355_s8, 4294959104 }
  0x23   : > { %1036 = dma.done.wait (%p1152_p1), [#allocation7], 4096  }
  0x24   : > { %1038 = vsyncadd (%p1152_p1), [#allocation7], 4294963200  ;;  %s858_s3 = sshll.u32 %s1053_s14, 1  ;;  %p860_p3 = scmp.ne.s32.totalorder %s1053_s14, 0 }
  0x25   : > { %p410_p2 = scmp.lt.s32.totalorder %s858_s3, 3 }
  0x26   : > { %425 = sbr.rel (%p860_p3) target bundleno = 46 (0x2e), region = 68 }
  0x27   : > { %s1398_s3 = smov (!%p410_p2, %s858_s3), 3 }
  0x28   : > { %s859_s9 = sshll.u32 %s1398_s3, 3 }
  0x29   : > { %s1218_s29 = scalar_lea.vmem %s1369_s0, %s859_s9 }
  0x2b   : > { %v1068_v1 = vmov 0.0  }
  0x2c   : > { %426 = vst [vmem:[#allocation2] sm:$0xff] %v1068_v1 }
  0x2d   : > { %427 = vst [vmem:[#allocation2 + $0x8] sm:$0xff] %v1068_v1 }
  0x2e PF: > { %v463_v2 = vld [vmem:[%s1204_s20 + $0xf8] sm:$0xff]  ;;  %v461_v4 = vld [vmem:[%s1204_s20 + $0xe8] sm:$0xff]  ;;  %v462_v8 = vld [vmem:[%s1204_s20 + $0xf0] sm:$0xff]  ;;  %p861_p1 = scmp.ne.s32.totalorder %s1053_s14, 1 }
  0x2f   : > { %v495_v3 = vld [vmem:[%s1204_s20 + $0x1f8] sm:$0xff]  ;;  %536 = vmatpush.msra.mxu2 %v463_v2  ;;  %v493_v5 = vld [vmem:[%s1204_s20 + $0x1e8] sm:$0xff]  ;;  %v494_v9 = vld [vmem:[%s1204_s20 + $0x1f0] sm:$0xff]  ;;  %496 = vmatpush.msra.mxu0 %v462_v8  ;;  %s1388_s11 = sld [smem:[#allocation12_spill]] (!%p861_p1) }
  0x30   : > { %556 = vmatpush.msra.mxu3 %v495_v3  ;;  %v459_v6 = vld [vmem:[%s1204_s20 + $0xd8] sm:$0xff]  ;;  %v460_v10 = vld [vmem:[%s1204_s20 + $0xe0] sm:$0xff]  ;;  %516 = vmatpush.msra.mxu1 %v494_v9  ;;  %v457_v12 = vld [vmem:[%s1204_s20 + $0xc8] sm:$0xff] }
  0x31   : > { %v491_v7 = vld [vmem:[%s1204_s20 + $0x1d8] sm:$0xff]  ;;  %537 = vmatpush.msra.mxu2 %v461_v4  ;;  %v492_v11 = vld [vmem:[%s1204_s20 + $0x1e0] sm:$0xff]  ;;  %v489_v13 = vld [vmem:[%s1204_s20 + $0x1c8] sm:$0xff]  ;;  %497 = vmatpush.msra.mxu0 %v460_v10 }
  0x32   : > { %557 = vmatpush.msra.mxu3 %v493_v5  ;;  %v458_v14 = vld [vmem:[%s1204_s20 + $0xd0] sm:$0xff]  ;;  %517 = vmatpush.msra.mxu1 %v492_v11  ;;  %v455_v16 = vld [vmem:[%s1204_s20 + $0xb8] sm:$0xff]  ;;  %v456_v18 = vld [vmem:[%s1204_s20 + $0xc0] sm:$0xff] }
  0x33   : > { %538 = vmatpush.msra.mxu2 %v459_v6  ;;  %v490_v15 = vld [vmem:[%s1204_s20 + $0x1d0] sm:$0xff]  ;;  %v487_v17 = vld [vmem:[%s1204_s20 + $0x1b8] sm:$0xff]  ;;  %v488_v19 = vld [vmem:[%s1204_s20 + $0x1c0] sm:$0xff]  ;;  %498 = vmatpush.msra.mxu0 %v458_v14 }
  0x34   : > { %558 = vmatpush.msra.mxu3 %v491_v7  ;;  %518 = vmatpush.msra.mxu1 %v490_v15  ;;  %v453_v20 = vld [vmem:[%s1204_s20 + $0xa8] sm:$0xff]  ;;  %v454_v22 = vld [vmem:[%s1204_s20 + $0xb0] sm:$0xff]  ;;  %v451_v24 = vld [vmem:[%s1204_s20 + $0x98] sm:$0xff] }
  0x35   : > { %539 = vmatpush.msra.mxu2 %v457_v12  ;;  %v485_v21 = vld [vmem:[%s1204_s20 + $0x1a8] sm:$0xff]  ;;  %v486_v23 = vld [vmem:[%s1204_s20 + $0x1b0] sm:$0xff]  ;;  %499 = vmatpush.msra.mxu0 %v456_v18  ;;  %v483_v25 = vld [vmem:[%s1204_s20 + $0x198] sm:$0xff] }
  0x36   : > { %559 = vmatpush.msra.mxu3 %v489_v13  ;;  %519 = vmatpush.msra.mxu1 %v488_v19  ;;  %v452_v26 = vld [vmem:[%s1204_s20 + $0xa0] sm:$0xff]  ;;  %v449_v28 = vld [vmem:[%s1204_s20 + $0x88] sm:$0xff]  ;;  %v450_v30 = vld [vmem:[%s1204_s20 + $0x90] sm:$0xff] }
  0x37   : > { %540 = vmatpush.msra.mxu2 %v455_v16  ;;  %v484_v27 = vld [vmem:[%s1204_s20 + $0x1a0] sm:$0xff]  ;;  %500 = vmatpush.msra.mxu0 %v454_v22  ;;  %v481_v29 = vld [vmem:[%s1204_s20 + $0x188] sm:$0xff]  ;;  %v482_v31 = vld [vmem:[%s1204_s20 + $0x190] sm:$0xff] }
  0x38   : > { %560 = vmatpush.msra.mxu3 %v487_v17  ;;  %520 = vmatpush.msra.mxu1 %v486_v23  ;;  %v447_v32 = vld [vmem:[%s1204_s20 + $0x78] sm:$0xff]  ;;  %v448_v34 = vld [vmem:[%s1204_s20 + $0x80] sm:$0xff]  ;;  %v445_v36 = vld [vmem:[%s1204_s20 + $0x68] sm:$0xff] }
  0x39   : > { %541 = vmatpush.msra.mxu2 %v453_v20  ;;  %501 = vmatpush.msra.mxu0 %v452_v26  ;;  %v479_v33 = vld [vmem:[%s1204_s20 + $0x178] sm:$0xff]  ;;  %v480_v35 = vld [vmem:[%s1204_s20 + $0x180] sm:$0xff]  ;;  %v477_v37 = vld [vmem:[%s1204_s20 + $0x168] sm:$0xff] }
  0x3a   : > { %561 = vmatpush.msra.mxu3 %v485_v21  ;;  %521 = vmatpush.msra.mxu1 %v484_v27  ;;  %v446_v38 = vld [vmem:[%s1204_s20 + $0x70] sm:$0xff]  ;;  %v443_v40 = vld [vmem:[%s1204_s20 + $0x58] sm:$0xff]  ;;  %v444_v42 = vld [vmem:[%s1204_s20 + $0x60] sm:$0xff] }
  0x3b   : > { %542 = vmatpush.msra.mxu2 %v451_v24  ;;  %502 = vmatpush.msra.mxu0 %v450_v30  ;;  %v478_v39 = vld [vmem:[%s1204_s20 + $0x170] sm:$0xff]  ;;  %v475_v41 = vld [vmem:[%s1204_s20 + $0x158] sm:$0xff]  ;;  %v476_v43 = vld [vmem:[%s1204_s20 + $0x160] sm:$0xff] }
  0x3c   : > { %562 = vmatpush.msra.mxu3 %v483_v25  ;;  %522 = vmatpush.msra.mxu1 %v482_v31  ;;  %v441_v44 = vld [vmem:[%s1204_s20 + $0x48] sm:$0xff]  ;;  %v442_v46 = vld [vmem:[%s1204_s20 + $0x50] sm:$0xff]  ;;  %v439_v48 = vld [vmem:[%s1204_s20 + $0x38] sm:$0xff] }
  0x3d   : > { %543 = vmatpush.msra.mxu2 %v449_v28  ;;  %503 = vmatpush.msra.mxu0 %v448_v34  ;;  %v473_v45 = vld [vmem:[%s1204_s20 + $0x148] sm:$0xff]  ;;  %v474_v47 = vld [vmem:[%s1204_s20 + $0x150] sm:$0xff]  ;;  %v471_v49 = vld [vmem:[%s1204_s20 + $0x138] sm:$0xff] }
  0x3e   : > { %563 = vmatpush.msra.mxu3 %v481_v29  ;;  %523 = vmatpush.msra.mxu1 %v480_v35  ;;  %v440_v50 = vld [vmem:[%s1204_s20 + $0x40] sm:$0xff]  ;;  %v437_v52 = vld [vmem:[%s1204_s20 + $0x28] sm:$0xff]  ;;  %v438_v54 = vld [vmem:[%s1204_s20 + $0x30] sm:$0xff] }
  0x3f   : > { %544 = vmatpush.msra.mxu2 %v447_v32  ;;  %504 = vmatpush.msra.mxu0 %v446_v38  ;;  %v472_v51 = vld [vmem:[%s1204_s20 + $0x140] sm:$0xff]  ;;  %v469_v53 = vld [vmem:[%s1204_s20 + $0x128] sm:$0xff]  ;;  %v470_v55 = vld [vmem:[%s1204_s20 + $0x130] sm:$0xff] }
  0x40   : > { %564 = vmatpush.msra.mxu3 %v479_v33  ;;  %524 = vmatpush.msra.mxu1 %v478_v39  ;;  %v435_v56 = vld [vmem:[%s1204_s20 + $0x18] sm:$0xff]  ;;  %v436_v58 = vld [vmem:[%s1204_s20 + $0x20] sm:$0xff]  ;;  %v433_v60 = vld [vmem:[%s1204_s20 + $0x8] sm:$0xff] }
  0x41   : > { %545 = vmatpush.msra.mxu2 %v445_v36  ;;  %505 = vmatpush.msra.mxu0 %v444_v42  ;;  %v467_v57 = vld [vmem:[%s1204_s20 + $0x118] sm:$0xff]  ;;  %v468_v59 = vld [vmem:[%s1204_s20 + $0x120] sm:$0xff]  ;;  %v465_v61 = vld [vmem:[%s1204_s20 + $0x108] sm:$0xff] }
  0x42   : > { %565 = vmatpush.msra.mxu3 %v477_v37  ;;  %525 = vmatpush.msra.mxu1 %v476_v43  ;;  %v430_v62 = vld [vmem:[%s1218_s29] sm:$0xff]  ;;  %v431_v63 = vld [vmem:[%s1218_s29 + $0x8] sm:$0xff]  ;;  %v432_v2 = vld [vmem:[%s1204_s20] sm:$0xff] }
  0x43   : > { %546 = vmatpush.msra.mxu2 %v443_v40  ;;  %506 = vmatpush.msra.mxu0 %v442_v46  ;;  %v434_v0 = vld [vmem:[%s1204_s20 + $0x10] sm:$0xff]  ;;  %v464_v3 = vld [vmem:[%s1204_s20 + $0x100] sm:$0xff] }
  0x44   : > { %566 = vmatpush.msra.mxu3 %v475_v41  ;;  %526 = vmatpush.msra.mxu1 %v474_v47  ;;  %v466_v1 = vld [vmem:[%s1204_s20 + $0x110] sm:$0xff] }
  0x45   : > { %547 = vmatpush.msra.mxu2 %v441_v44  ;;  %507 = vmatpush.msra.mxu0 %v440_v50  ;;  %v428_v5 = vld [vmem:[#allocation2] sm:$0xff]  ;;  %v429_v9 = vld [vmem:[#allocation2 + $0x8] sm:$0xff] }
  0x46   : > { %567 = vmatpush.msra.mxu3 %v473_v45  ;;  %527 = vmatpush.msra.mxu1 %v472_v51 }
  0x47   : > { %548 = vmatpush.msra.mxu2 %v439_v48  ;;  %508 = vmatpush.msra.mxu0 %v438_v54 }
  0x48   : > { %568 = vmatpush.msra.mxu3 %v471_v49  ;;  %528 = vmatpush.msra.mxu1 %v470_v55 }
  0x49   : > { %549 = vmatpush.msra.mxu2 %v437_v52  ;;  %509 = vmatpush.msra.mxu0 %v436_v58 }
  0x4a   : > { %569 = vmatpush.msra.mxu3 %v469_v53  ;;  %529 = vmatpush.msra.mxu1 %v468_v59 }
  0x4b   : > { %550 = vmatpush.msra.mxu2 %v435_v56  ;;  %510 = vmatpush.msra.mxu0 %v434_v0 }
  0x4c   : > { %570 = vmatpush.msra.mxu3 %v467_v57  ;;  %530 = vmatpush.msra.mxu1 %v466_v1 }
  0x4d   : > { %551 = vmatpush.msra.mxu2 %v433_v60  ;;  %511 = vmatpush.msra.mxu0 %v432_v2 }
  0x4e   : > { %571 = vmatpush.msra.mxu3 %v465_v61  ;;  %552 = vmatmul.f32.vlgmr.msra.gmra.mxu2 %v430_v62 }
  0x4f   : > { %572 = vmatmul.f32.vlgmr.msra.gmra.mxu3 %v431_v63  ;;  %531 = vmatpush.msra.mxu1 %v464_v3 }
  0x50   : > { %512 = vmatmul.f32.vlgmr.msra.gmra.mxu0 %v430_v62  ;;  %532 = vmatmul.f32.vlgmr.msra.gmra.mxu1 %v431_v63 }
  0xcd   : > { %v513_v4 = vpop.f32.mrf.mxu0  ;;  %v533_v6 = vpop.f32.mrf.mxu1 }
  0xce   : > { %v534_v7 = vadd.f32 %v533_v6, %v513_v4 }
  0xd0   : > { %v576_v11 = vadd.f32 %v534_v7, %v428_v5 }
  0xd1   : > { %v553_v8 = vpop.f32.mrf.mxu2 }
  0xd2   : > { %v573_v10 = vpop.f32.mrf.mxu3  ;;  %578 = vst [vmem:[#allocation2] sm:$0xff] %v576_v11 }
  0xd3   : > { %v574_v12 = vadd.f32 %v573_v10, %v553_v8  ;;  %583 = sbr.rel (%p861_p1) target bundleno = 666 (0x29a), region = 72 }
  0xd5   : > { %v577_v13 = vadd.f32 %v574_v12, %v429_v9 }
  0xd7   : > { %579 = vst [vmem:[#allocation2 + $0x8] sm:$0xff] %v577_v13 }
  0xd8   : > { %v611_v14 = vld [vmem:[#allocation6 + $0x78] sm:$0xff]  ;;  %v610_v15 = vld [vmem:[#allocation6 + $0x70] sm:$0xff]  ;;  %v609_v18 = vld [vmem:[#allocation6 + $0x68] sm:$0xff]  ;;  %vm719_vm0 = vcmask 523264   ;;  %vm747_vm4 = vcmask 7168  }
  0xd9   : > { %v627_v16 = vld [vmem:[#allocation6 + $0xf8] sm:$0xff]  ;;  %632 = vmatpush.msra.mxu0 %v611_v14  ;;  %v626_v17 = vld [vmem:[#allocation6 + $0xf0] sm:$0xff]  ;;  %v625_v19 = vld [vmem:[#allocation6 + $0xe8] sm:$0xff] }
  0xda   : > { %652 = vmatpush.msra.mxu1 %v627_v16  ;;  %v608_v20 = vld [vmem:[#allocation6 + $0x60] sm:$0xff]  ;;  %v607_v22 = vld [vmem:[#allocation6 + $0x58] sm:$0xff]  ;;  %v606_v24 = vld [vmem:[#allocation6 + $0x50] sm:$0xff] }
  0xdb   : > { %633 = vmatpush.msra.mxu0 %v610_v15  ;;  %v624_v21 = vld [vmem:[#allocation6 + $0xe0] sm:$0xff]  ;;  %v623_v23 = vld [vmem:[#allocation6 + $0xd8] sm:$0xff]  ;;  %v622_v25 = vld [vmem:[#allocation6 + $0xd0] sm:$0xff] }
  0xdc   : > { %653 = vmatpush.msra.mxu1 %v626_v17  ;;  %v605_v26 = vld [vmem:[#allocation6 + $0x48] sm:$0xff]  ;;  %v604_v29 = vld [vmem:[#allocation6 + $0x40] sm:$0xff]  ;;  %v686_v32 = vld [vmem:[%s1374_s5 + $0x68] sm:$0xff] }
  0xdd   : > { %634 = vmatpush.msra.mxu0 %v609_v18  ;;  %v621_v27 = vld [vmem:[#allocation6 + $0xc8] sm:$0xff]  ;;  %v620_v30 = vld [vmem:[#allocation6 + $0xc0] sm:$0xff]  ;;  %v603_v33 = vld [vmem:[#allocation6 + $0x38] sm:$0xff] }
  0xde   : > { %654 = vmatpush.msra.mxu1 %v625_v19  ;;  %v688_v28 = vld [vmem:[%s1374_s5 + $0x78] sm:$0xff]  ;;  %v687_v31 = vld [vmem:[%s1374_s5 + $0x70] sm:$0xff]  ;;  %v602_v35 = vld [vmem:[#allocation6 + $0x30] sm:$0xff] }
  0xdf   : > { %635 = vmatpush.msra.mxu0 %v608_v20  ;;  %693 = vmatpush.msra.mxu2 %v688_v28  ;;  %v619_v34 = vld [vmem:[#allocation6 + $0xb8] sm:$0xff]  ;;  %v685_v36 = vld [vmem:[%s1374_s5 + $0x60] sm:$0xff]  ;;  %v684_v39 = vld [vmem:[%s1374_s5 + $0x58] sm:$0xff] }
  0xe0   : > { %655 = vmatpush.msra.mxu1 %v624_v21  ;;  %v618_v37 = vld [vmem:[#allocation6 + $0xb0] sm:$0xff]  ;;  %v601_v40 = vld [vmem:[#allocation6 + $0x28] sm:$0xff]  ;;  %v683_v42 = vld [vmem:[%s1374_s5 + $0x50] sm:$0xff] }
  0xe1   : > { %636 = vmatpush.msra.mxu0 %v607_v22  ;;  %694 = vmatpush.msra.mxu2 %v687_v31  ;;  %v586_v38 = vld [vmem:[%s1371_s2] sm:$0x3]  ;;  %v600_v43 = vld [vmem:[#allocation6 + $0x20] sm:$0xff]  ;;  %v585_v48 = vld [vmem:[#allocation2 + $0x8] sm:$0xff] }
  0xe2   : > { %656 = vmatpush.msra.mxu1 %v623_v23  ;;  %v617_v41 = vld [vmem:[#allocation6 + $0xa8] sm:$0xff]  ;;  %v616_v44 = vld [vmem:[#allocation6 + $0xa0] sm:$0xff]  ;;  %v588_v45 = vperm.slane %v586_v38, 0  ;;  %v589_v46 = vperm.slane %v586_v38, 1  ;;  %v682_v49 = vld [vmem:[%s1374_s5 + $0x48] sm:$0xff] }
  0xe3   : > { %637 = vmatpush.msra.mxu0 %v606_v24  ;;  %695 = vmatpush.msra.mxu2 %v686_v32  ;;  %v584_v47 = vld [vmem:[#allocation2] sm:$0xff]  ;;  %v599_v50 = vld [vmem:[#allocation6 + $0x18] sm:$0xff]  ;;  %v680_v57 = vld [vmem:[%s1374_s5 + $0x38] sm:$0xff] }
  0xe4   : > { %657 = vmatpush.msra.mxu1 %v622_v25  ;;  %v615_v51 = vld [vmem:[#allocation6 + $0x98] sm:$0xff]  ;;  %v681_v52 = vld [vmem:[%s1374_s5 + $0x40] sm:$0xff]  ;;  %v592_v55 = vadd.f32 %v588_v45, %v584_v47  ;;  %v593_v56 = vadd.f32 %v589_v46, %v585_v48  ;;  %v596_v61 = vld [vmem:[#allocation6] sm:$0xff] }
  0xe5   : > { %638 = vmatpush.msra.mxu0 %v605_v26  ;;  %696 = vmatpush.msra.mxu2 %v685_v36  ;;  %v598_v53 = vld [vmem:[#allocation6 + $0x10] sm:$0xff]  ;;  %v597_v58 = vld [vmem:[#allocation6 + $0x8] sm:$0xff]  ;;  %v679_v60 = vld [vmem:[%s1374_s5 + $0x30] sm:$0xff] }
  0xe6   : > { %658 = vmatpush.msra.mxu1 %v621_v27  ;;  %v614_v54 = vld [vmem:[#allocation6 + $0x90] sm:$0xff]  ;;  %v613_v59 = vld [vmem:[#allocation6 + $0x88] sm:$0xff]  ;;  %v594_v62 = vmax.f32 %v592_v55, 0.0  ;;  %v612_v63 = vld [vmem:[#allocation6 + $0x80] sm:$0xff]  ;;  %v595_v0 = vmax.f32 %v593_v56, 0.0 }
  0xe7   : > { %639 = vmatpush.msra.mxu0 %v604_v29  ;;  %697 = vmatpush.msra.mxu2 %v684_v39  ;;  %v678_v1 = vld [vmem:[%s1374_s5 + $0x28] sm:$0xff]  ;;  %v677_v2 = vld [vmem:[%s1374_s5 + $0x20] sm:$0xff]  ;;  %v676_v3 = vld [vmem:[%s1374_s5 + $0x18] sm:$0xff] }
  0xe8   : > { %659 = vmatpush.msra.mxu1 %v620_v30  ;;  %v675_v4 = vld [vmem:[%s1374_s5 + $0x10] sm:$0xff]  ;;  %v674_v5 = vld [vmem:[%s1374_s5 + $0x8] sm:$0xff]  ;;  %v673_v6 = vld [vmem:[%s1374_s5] sm:$0xff] }
  0xe9   : > { %640 = vmatpush.msra.mxu0 %v603_v33  ;;  %698 = vmatpush.msra.mxu2 %v683_v42  ;;  %v939_v7 = vld [vmem:[%s1373_s4] ss:$0 sm:$0xff]  ;;  %v942_v20 = vld [vmem:[#allocation3] ss:$0 sm:$0xff] }
  0xea   : > { %660 = vmatpush.msra.mxu1 %v619_v34  ;;  %v940_v13 = vld [vmem:[%s1375_s6] ss:$0 sm:$0xff] }
  0xeb   : > { %641 = vmatpush.msra.mxu0 %v602_v35  ;;  %699 = vmatpush.msra.mxu2 %v682_v49  ;;  %v941_v16 = vld [vmem:[%s1376_s7] ss:$0 sm:$0xff] }
  0xec   : > { %661 = vmatpush.msra.mxu1 %v618_v37 }
  0xed   : > { %642 = vmatpush.msra.mxu0 %v601_v40  ;;  %700 = vmatpush.msra.mxu2 %v681_v52 }
  0xee   : > { %662 = vmatpush.msra.mxu1 %v617_v41 }
  0xef   : > { %643 = vmatpush.msra.mxu0 %v600_v43  ;;  %701 = vmatpush.msra.mxu2 %v680_v57 }
  0xf0   : > { %663 = vmatpush.msra.mxu1 %v616_v44 }
  0xf1   : > { %644 = vmatpush.msra.mxu0 %v599_v50  ;;  %702 = vmatpush.msra.mxu2 %v679_v60 }
  0xf2   : > { %664 = vmatpush.msra.mxu1 %v615_v51 }
  0xf3   : > { %645 = vmatpush.msra.mxu0 %v598_v53  ;;  %703 = vmatpush.msra.mxu2 %v678_v1 }
  0xf4   : > { %665 = vmatpush.msra.mxu1 %v614_v54 }
  0xf5   : > { %646 = vmatpush.msra.mxu0 %v597_v58  ;;  %704 = vmatpush.msra.mxu2 %v677_v2 }
  0xf6   : > { %666 = vmatpush.msra.mxu1 %v613_v59 }
  0xf7   : > { %647 = vmatpush.msra.mxu0 %v596_v61  ;;  %705 = vmatpush.msra.mxu2 %v676_v3 }
  0xf8   : > { %667 = vmatpush.msra.mxu1 %v612_v63  ;;  %648 = vmatmul.f32.vlgmr.msra.gmra.mxu0 %v594_v62 }
  0xf9   : > { %668 = vmatmul.f32.vlgmr.msra.gmra.mxu1 %v595_v0  ;;  %706 = vmatpush.msra.mxu2 %v675_v4 }
  0xfb   : > { %707 = vmatpush.msra.mxu2 %v674_v5 }
  0xfd   : > { %708 = vmatpush.msra.mxu2 %v673_v6 }
 0x175   : > { %v649_v8 = vpop.f32.mrf.mxu0 }
 0x176   : > { %v669_v9 = vpop.f32.mrf.mxu1  ;;  %v650_v10 = vadd.f32 %v939_v7, %v649_v8 }
 0x178   : > { %v670_v11 = vadd.f32 %v669_v9, %v650_v10 }
 0x17a   : > { %v672_v12 = vmax.f32 %v670_v11, 0.0 }
 0x17c   : > { %709 = vmatmul.f32.vlgmr.msra.gmra.mxu2 %v672_v12 }
 0x1ff   : > { %v710_v14 = vpop.f32.mrf.mxu2 }
 0x200   : > { %v711_v15 = vadd.f32 %v940_v13, %v710_v14 }
 0x202   : > { %v713_v17 = vmax.f32 %v711_v15, 0.0 }
 0x204   : > { %v718_v18 = vmul.f32 %v941_v16, %v713_v17 }
 0x206   : > { %v720_v19 = vsel %vm719_vm0, %v718_v18, 0.0 }
 0x207   : > { %721 = vadd.xlane.f32.xlu0 %v720_v19 }
 0x27a   : > { %v722_v21 = vpop.xlane.xlu0 %721 }
 0x27b   : > { %v727_v22 = vadd.f32 %v942_v20, %v722_v21 }
 0x27d   : > { %v862_v23 = vmul.f32 -1.442695, %v727_v22 }
 0x27f   : > { %943 = vpow2.f32 %v862_v23 }
 0x285   : > { %v944_v24 = vpop.eup %943 }
 0x286   : > { %v731_v25 = vadd.f32 1.0, %v944_v24 }
 0x288   : > { %945 = vrcp.f32 %v731_v25  ;;  %v743_v29 = vand.u32 2147483648, %v731_v25  ;;  %v741_v31 = vand.u32 2147483647, %v731_v25  ;;  %vm737_vm2 = vweird.f32 %v731_v25 }
 0x28a   : > { %v744_v33 = vor.u32 1.1754944e-38, %v743_v29  ;;  %vm742_vm5 = vcmp.eq.f32.partialorder %v741_v31, 8.507059e+37 }
 0x28e   : > { %v946_v26 = vpop.eup %945 }
 0x28f   : > { %v733_v27 = vmul.f32 %v946_v26, %v731_v25  ;;  %vm738_vm1 = vweird.f32 %v946_v26 }
 0x290   : > { %vm739_vm3 = vmor %vm737_vm2, %vm738_vm1 }
 0x291   : > { %v734_v28 = vsub.f32 1.0, %v733_v27 }
 0x293   : > { %v735_v30 = vmul.f32 %v946_v26, %v734_v28 }
 0x295   : > { %v736_v32 = vadd.f32 %v946_v26, %v735_v30 }
 0x297   : > { %v740_v34 = vsel %vm739_vm3, %v946_v26, %v736_v32 }
 0x298   : > { %v745_v35 = vsel %vm742_vm5, %v744_v33, %v740_v34 }
 0x299   : > { %748 = vst.msk [vmem:[%s1388_s11] sm:$0xff] %vm747_vm4, %v745_v35 }
 0x29a PF: > { %s25_s16 = sadd.s32 1, %s1061_s16   ;;  %s1389_s21 = sld [smem:[#allocation10_spill]] }
 0x29b   : > { %p22_p4 = scmp.ge.s32.totalorder %s25_s16, 4   ;;  %s1390_s11 = smov %s1045_s12 }
 0x29c   : > { %s1391_s12 = smov %s1049_s13  ;;  %s1392_s13 = smov %s1192_s19 }
 0x29d   : > { %s1393_s14 = smov %s1057_s15  ;;  %24 = sbr.rel (!%p22_p4) target bundleno = 8 (0x8), region = 111 }
 0x2a0   : > { %s1394_s15 = smov %s1389_s21 }
 0x2a2   :  { %768 = vsyncpa [#allocation5], 1 }
 0x2a3   :  { %770 = vsyncpa [#allocation5 + $0x1], 1 }
 0x2a4   :  { %771 = vsyncpa [#allocation7], 1 }

</bundles_post_ra>
